<compile_context>
chip_gen: v7x
topology: tpu7x:2x2x1
jax: 0.10.0
libtpu: 0.0.40
codegen_flags: <defaults>
</compile_context>

<pallas_src>
import functools

import jax
import jax.numpy as jnp
from jax.experimental import pallas as pl
from jax.experimental.pallas import tpu as pltpu


def _round_up(x, m):
    return ((x + m - 1) // m) * m


def _device_kind():
    try:
        return jax.devices()[0].device_kind.lower()
    except Exception:
        return ""


def _vmem_capacity_bytes():
    try:
        return int(pltpu.get_tpu_info().vmem_capacity_bytes)
    except Exception:
        pass
    kind = _device_kind()
    if "v5" in kind or "v6" in kind:
        return 128 * 1024 * 1024
    return 64 * 1024 * 1024          # conservative (v7x: 64 MiB per TC)


def _default_gelu_bf16():
    # v5e has no bf16 VPU/EUP path; keep the GELU in f32 there.
    return "v5" not in _device_kind()


def _residual_ff_kernel(x_ref, w1_ref, b1_ref, w2_ref, b2_ref, o_ref, *,
                        gelu_bf16):
    # x: (TM, Dp) f32      w1: (Dp, TH) bf16     b1: (1, TH) f32
    # w2: (TH, Dp) bf16    b2: (1, Dp)  f32      o: (TM, Dp) f32
    k = pl.program_id(1)

    x_bf = x_ref[...].astype(jnp.bfloat16)                 # MXU operand
    h = jnp.dot(x_bf, w1_ref[...], preferred_element_type=jnp.float32)
    h = h + b1_ref[...]                                    # bias in f32
    if gelu_bf16:
        a = jax.nn.gelu(h.astype(jnp.bfloat16))            # bf16 VPU/EUP (v6e/v7x)
    else:
        a = jax.nn.gelu(h).astype(jnp.bfloat16)            # f32 GELU (v5e)
    y = jnp.dot(a, w2_ref[...], preferred_element_type=jnp.float32)

    @pl.when(k == 0)
    def _():
        # Re-read x_ref for the residual add instead of keeping the f32 tile
        # live across both matmuls (cheap vld, lower vreg/scratch pressure).
        o_ref[...] = (y + b2_ref[...]
                      + x_ref[...].astype(jnp.float32)).astype(o_ref.dtype)

    @pl.when(k > 0)
    def _():
        # Hidden-dim-tiled fallback: accumulate the partial second matmul in
        # the resident output block (same block index across k -> stays VMEM).
        o_ref[...] = o_ref[...] + y.astype(o_ref.dtype)


def prepare_residual_ff_params(w1, b1, w2, b2):
    """Pad to lane-dense (128-multiple) shapes and cast weights to bf16 ONCE
    (outside the hot path) so per-call HBM traffic is just x in / out."""
    D, H = w1.shape
    Dp, Hp = _round_up(D, 128), _round_up(H, 128)
    w1p = jnp.pad(w1, ((0, Dp - D), (0, Hp - H))) if (Dp, Hp) != (D, H) else w1
    w2p = jnp.pad(w2, ((0, Hp - H), (0, Dp - D))) if (Dp, Hp) != (D, H) else w2
    b1p = b1.reshape(1, H)
    b2p = b2.reshape(1, D)
    if Hp != H:
        b1p = jnp.pad(b1p, ((0, 0), (0, Hp - H)))
    if Dp != D:
        b2p = jnp.pad(b2p, ((0, 0), (0, Dp - D)))
    return {
        "w1": w1p.astype(jnp.bfloat16),
        "b1": b1p.astype(jnp.float32),
        "w2": w2p.astype(jnp.bfloat16),
        "b2": b2p.astype(jnp.float32),
        "dim": D,
        "hidden": H,
    }


def _plan_tiling(M, Dp, Hp, tile_m_req, vmem_budget, force_tile_h=None):
    # Row tile: multiple of 8; keep >= 2 row blocks whenever possible so the
    # "parallel" row axis can shard across both TensorCores (v7x megacore).
    cap_two_blocks = _round_up(max(1, -(-M // 2)), 8)
    tile_m = max(8, _round_up(min(tile_m_req, cap_two_blocks), 8))

    def need(tm, th, resident):
        act = 2 * 2 * tm * Dp * 4            # x + out tiles, double buffered
        hid = 3 * tm * th * 4                # hidden activations (f32 + bf16)
        if resident:
            w = 2 * Dp * th * 2              # whole bf16 w1 + w2, single copy
        else:
            w = 2 * 2 * Dp * th * 2          # bf16 w1/w2 tiles, double buffered
        return act + hid + w + 8 * (Hp + Dp) * 4

    if force_tile_h is not None:
        assert Hp % force_tile_h == 0
        resident = force_tile_h == Hp
        return tile_m, force_tile_h, resident, need(tile_m, force_tile_h, resident)

    # Preferred: whole weights resident in VMEM; shrink tile_m if necessary.
    tm = tile_m
    while tm > 64 and need(tm, Hp, True) > vmem_budget:
        tm = max(64, _round_up(tm // 2, 8))
    if need(tm, Hp, True) <= vmem_budget:
        return tm, Hp, True, need(tm, Hp, True)

    # Fallback (e.g. large D*H on v7x's 64 MiB): tile the hidden dim and
    # accumulate the second matmul in the resident output block.
    tm = min(tile_m, 256)
    th = 128
    for cand in range(Hp, 127, -128):
        if Hp % cand == 0 and need(tm, cand, False) <= vmem_budget:
            th = cand
            break
    return tm, th, False, need(tm, th, False)


def residual_feedforward(x, params, *, tile_m=None, gelu_bf16=None,
                         force_tile_h=None):
    """x: (B, N, D) float32 -> (B, N, D) computing FeedForward(x) + x."""
    B, N, D = x.shape
    assert D == params["dim"]
    w1, b1, w2, b2 = params["w1"], params["b1"], params["w2"], params["b2"]
    Dp, Hp = w1.shape
    M = B * N

    vmem_cap = _vmem_capacity_bytes()
    if gelu_bf16 is None:
        gelu_bf16 = _default_gelu_bf16()
    if tile_m is None:
        tile_m = 512 if vmem_cap >= (96 << 20) else 256

    tile_m, tile_h, resident, needed = _plan_tiling(
        M, Dp, Hp, tile_m, (vmem_cap * 3) // 4, force_tile_h)
    grid_m = pl.cdiv(M, tile_m)
    grid_h = Hp // tile_h

    # No-pad fast path: reshape is free; pad columns only when D < Dp.  Rows
    # are never padded -- the last row block may be partial (masked stores).
    x2 = x.reshape(M, D)
    if Dp != D:
        x2 = jnp.pad(x2, ((0, 0), (0, Dp - D)))

    x_spec = pl.BlockSpec((tile_m, Dp), lambda i, k: (i, 0))
    out_spec = pl.BlockSpec((tile_m, Dp), lambda i, k: (i, 0))
    if resident:
        # Weights/biases resident whole in VMEM once (no double buffering).
        in_specs = [x_spec] + [pl.BlockSpec(memory_space=pltpu.MemorySpace.VMEM)] * 4
    else:
        in_specs = [
            x_spec,
            pl.BlockSpec((Dp, tile_h), lambda i, k: (0, k)),     # w1 columns
            pl.BlockSpec((1, tile_h), lambda i, k: (0, k)),      # b1 slice
            pl.BlockSpec((tile_h, Dp), lambda i, k: (k, 0)),     # w2 rows
            pl.BlockSpec(memory_space=pltpu.MemorySpace.VMEM),   # b2 (tiny)
        ]

    vmem_limit = int(min(vmem_cap - (4 << 20), max(needed * 3 // 2, 32 << 20)))
    vmem_limit = int(max(vmem_limit, needed + (2 << 20)))

    cost = pl.CostEstimate(
        flops=4 * M * Dp * Hp,                              # two matmuls
        transcendentals=M * Hp,                             # GELU
        bytes_accessed=2 * M * Dp * 4 + 2 * Dp * Hp * 2 + (Hp + Dp) * 4,
    )

    kernel = functools.partial(_residual_ff_kernel, gelu_bf16=gelu_bf16)

    out = pl.pallas_call(
        kernel,
        out_shape=jax.ShapeDtypeStruct((M, Dp), x.dtype),
        grid_spec=pltpu.PrefetchScalarGridSpec(
            num_scalar_prefetch=0,
            grid=(grid_m, grid_h),
            in_specs=in_specs,
            out_specs=out_spec,
        ),
        compiler_params=pltpu.CompilerParams(
            dimension_semantics=("parallel", "arbitrary"),
            vmem_limit_bytes=vmem_limit,
        ),
        cost_estimate=cost,
    )(x2, w1, b1, w2, b2)

    if Dp != D:
        out = out[:, :D]
    return out.reshape(B, N, D)


def reference_f32(x, w1, b1, w2, b2):
    h = jax.nn.gelu(jnp.einsum("bnd,dh->bnh", x, w1) + b1)
    return jnp.einsum("bnh,hd->bnd", h, w2) + b2 + x


def reference_matched(x, w1, b1, w2, b2, gelu_bf16):
    # Mirrors the kernel arithmetic: bf16 matmul operands, f32 accumulation,
    # f32 bias, GELU in bf16 or f32, f32 residual add.
    bf = lambda a: a.astype(jnp.bfloat16)
    h = jnp.einsum("bnd,dh->bnh", bf(x), bf(w1),
                   preferred_element_type=jnp.float32) + b1
    a = jax.nn.gelu(bf(h)) if gelu_bf16 else bf(jax.nn.gelu(h))
    y = jnp.einsum("bnh,hd->bnd", a, bf(w2), preferred_element_type=jnp.float32)
    return y + b2 + x


if __name__ == "__main__":
    key = jax.random.PRNGKey(0)

    def make_case(k, B, N, D, H):
        k_x, k_w1, k_b1, k_w2, k_b2 = jax.random.split(k, 5)
        x = jax.random.normal(k_x, (B, N, D), dtype=jnp.float32)
        w1 = jax.random.normal(k_w1, (D, H), dtype=jnp.float32) * (1.0 / D) ** 0.5
        b1 = jax.random.normal(k_b1, (H,), dtype=jnp.float32) * 0.01
        w2 = jax.random.normal(k_w2, (H, D), dtype=jnp.float32) * (1.0 / H) ** 0.5
        b2 = jax.random.normal(k_b2, (D,), dtype=jnp.float32) * 0.01
        return x, w1, b1, w2, b2

    gelu_mode = _default_gelu_bf16()
    k1, k2 = jax.random.split(key)

    # Case 1: small unaligned dims (D=32 -> 128, H=64 -> 128), resident weights.
    x, w1, b1, w2, b2 = make_case(k1, 2, 8, 32, 64)
    params = prepare_residual_ff_params(w1, b1, w2, b2)
    out = jax.block_until_ready(residual_feedforward(x, params))
    assert out.shape == x.shape
    assert jnp.allclose(out, reference_matched(x, w1, b1, w2, b2, gelu_mode),
                        atol=2.5e-2, rtol=2.5e-2), "case1: mismatch vs matched ref"
    assert jnp.allclose(out, reference_f32(x, w1, b1, w2, b2),
                        atol=8e-2, rtol=8e-2), "case1: mismatch vs f32 ref"

    # Case 2: lane-aligned dims (no-pad fast path), multi-step row grid, and
    # forced hidden-dim tiling (exercises the VMEM-fallback accumulation path).
    xb, w1b, b1b, w2b, b2b = make_case(k2, 2, 8, 256, 512)
    paramsb = prepare_residual_ff_params(w1b, b1b, w2b, b2b)
    outb = jax.block_until_ready(
        residual_feedforward(xb, paramsb, tile_m=8, force_tile_h=256))
    assert outb.shape == xb.shape
    assert jnp.allclose(outb, reference_matched(xb, w1b, b1b, w2b, b2b, gelu_mode),
                        atol=2.5e-2, rtol=2.5e-2), "case2: mismatch vs matched ref"
    assert jnp.allclose(outb, reference_f32(xb, w1b, b1b, w2b, b2b),
                        atol=8e-2, rtol=8e-2), "case2: mismatch vs f32 ref"

    print("KERNEL_OK")
</pallas_src>

<mosaic_0001>
module attributes {stable_mosaic.version = 11 : i64} {
  func.func @_residual_ff_kernel(%arg0: i32, %arg1: i32, %arg2: memref<8x128xf32, #tpu.memory_space<vmem>>, %arg3: memref<128x128xbf16, #tpu.memory_space<vmem>>, %arg4: memref<1x128xf32, #tpu.memory_space<vmem>>, %arg5: memref<128x128xbf16, #tpu.memory_space<vmem>>, %arg6: memref<1x128xf32, #tpu.memory_space<vmem>>, %arg7: memref<8x128xf32, #tpu.memory_space<vmem>>) attributes {dimension_semantics = [#tpu.dimension_semantics<parallel>, #tpu.dimension_semantics<arbitrary>], iteration_bounds = array<i64: 2, 1>, scalar_prefetch = 0 : i64, scratch_operands = 0 : i64, tpu.core_type = #tpu.core_type<tc>, window_params = [{transform_indices = @transform_0, window_bounds = array<i64: 8, 128>}, {pipeline_mode = #tpu.pipeline_mode<synchronous>, transform_indices = @transform_1, window_bounds = array<i64: 128, 128>}, {pipeline_mode = #tpu.pipeline_mode<synchronous>, transform_indices = @transform_2, window_bounds = array<i64: 1, 128>}, {pipeline_mode = #tpu.pipeline_mode<synchronous>, transform_indices = @transform_3, window_bounds = array<i64: 128, 128>}, {pipeline_mode = #tpu.pipeline_mode<synchronous>, transform_indices = @transform_4, window_bounds = array<i64: 1, 128>}, {transform_indices = @transform_5, window_bounds = array<i64: 8, 128>}]} {
    %c0 = arith.constant 0 : index
    %c0_0 = arith.constant 0 : index
    %0 = vector.load %arg2[%c0, %c0_0] : memref<8x128xf32, #tpu.memory_space<vmem>>, vector<8x128xf32>
    %1 = arith.truncf %0 : vector<8x128xf32> to vector<8x128xbf16>
    %c0_1 = arith.constant 0 : index
    %c0_2 = arith.constant 0 : index
    %2 = vector.load %arg3[%c0_1, %c0_2] : memref<128x128xbf16, #tpu.memory_space<vmem>>, vector<128x128xbf16>
    %cst = arith.constant dense<0.000000e+00> : vector<8x128xf32>
    %3 = tpu.matmul %1, %2, %cst {dimension_numbers = #tpu.dot_dimension_numbers<[1], [0], [0], [1], [0, 0, 1, 1], [], []>} : vector<8x128xbf16>, vector<128x128xbf16>, vector<8x128xf32> -> vector<8x128xf32>
    %c0_3 = arith.constant 0 : index
    %c0_4 = arith.constant 0 : index
    %4 = vector.load %arg4[%c0_3, %c0_4] : memref<1x128xf32, #tpu.memory_space<vmem>>, vector<1x128xf32>
    %5 = vector.broadcast %4 : vector<1x128xf32> to vector<8x128xf32>
    %6 = arith.addf %3, %5 : vector<8x128xf32>
    %7 = arith.truncf %6 : vector<8x128xf32> to vector<8x128xbf16>
    %8 = arith.mulf %7, %7 : vector<8x128xbf16>
    %9 = arith.mulf %7, %8 : vector<8x128xbf16>
    %cst_5 = arith.constant 4.467770e-02 : bf16
    %10 = vector.broadcast %cst_5 : bf16 to vector<8x128xbf16>
    %11 = arith.mulf %10, %9 : vector<8x128xbf16>
    %12 = arith.addf %7, %11 : vector<8x128xbf16>
    %cst_6 = arith.constant 7.968750e-01 : bf16
    %13 = vector.broadcast %cst_6 : bf16 to vector<8x128xbf16>
    %14 = arith.mulf %13, %12 : vector<8x128xbf16>
    %15 = math.tanh %14 : vector<8x128xbf16>
    %cst_7 = arith.constant 1.000000e+00 : bf16
    %16 = vector.broadcast %cst_7 : bf16 to vector<8x128xbf16>
    %17 = arith.addf %16, %15 : vector<8x128xbf16>
    %cst_8 = arith.constant 5.000000e-01 : bf16
    %18 = vector.broadcast %cst_8 : bf16 to vector<8x128xbf16>
    %19 = arith.mulf %18, %17 : vector<8x128xbf16>
    %20 = arith.mulf %7, %19 : vector<8x128xbf16>
    %c0_9 = arith.constant 0 : index
    %c0_10 = arith.constant 0 : index
    %21 = vector.load %arg5[%c0_9, %c0_10] : memref<128x128xbf16, #tpu.memory_space<vmem>>, vector<128x128xbf16>
    %cst_11 = arith.constant dense<0.000000e+00> : vector<8x128xf32>
    %22 = tpu.matmul %20, %21, %cst_11 {dimension_numbers = #tpu.dot_dimension_numbers<[1], [0], [0], [1], [0, 0, 1, 1], [], []>} : vector<8x128xbf16>, vector<128x128xbf16>, vector<8x128xf32> -> vector<8x128xf32>
    %c0_i32 = arith.constant 0 : i32
    %23 = arith.cmpi eq, %arg1, %c0_i32 : i32
    %24 = arith.extui %23 : i1 to i32
    %c0_i32_12 = arith.constant 0 : i32
    %25 = arith.cmpi ne, %24, %c0_i32_12 : i32
    scf.if %25 {
      %c0_15 = arith.constant 0 : index
      %c0_16 = arith.constant 0 : index
      %29 = vector.load %arg6[%c0_15, %c0_16] : memref<1x128xf32, #tpu.memory_space<vmem>>, vector<1x128xf32>
      %30 = vector.broadcast %29 : vector<1x128xf32> to vector<8x128xf32>
      %31 = arith.addf %22, %30 : vector<8x128xf32>
      %c0_17 = arith.constant 0 : index
      %c0_18 = arith.constant 0 : index
      %32 = vector.load %arg2[%c0_17, %c0_18] : memref<8x128xf32, #tpu.memory_space<vmem>>, vector<8x128xf32>
      %33 = arith.addf %31, %32 : vector<8x128xf32>
      %c0_19 = arith.constant 0 : index
      %c0_20 = arith.constant 0 : index
      %34 = vector.load %arg7[%c0_19, %c0_20] : memref<8x128xf32, #tpu.memory_space<vmem>>, vector<8x128xf32>
      tpu.vector_store %arg7[%c0_19, %c0_20], %33 {strides = array<i32>} : memref<8x128xf32, #tpu.memory_space<vmem>>, vector<8x128xf32>,
    } else {
    }
    %c0_i32_13 = arith.constant 0 : i32
    %26 = arith.cmpi sgt, %arg1, %c0_i32_13 : i32
    %27 = arith.extui %26 : i1 to i32
    %c0_i32_14 = arith.constant 0 : i32
    %28 = arith.cmpi ne, %27, %c0_i32_14 : i32
    scf.if %28 {
      %c0_15 = arith.constant 0 : index
      %c0_16 = arith.constant 0 : index
      %29 = vector.load %arg7[%c0_15, %c0_16] : memref<8x128xf32, #tpu.memory_space<vmem>>, vector<8x128xf32>
      %30 = arith.addf %29, %22 : vector<8x128xf32>
      %c0_17 = arith.constant 0 : index
      %c0_18 = arith.constant 0 : index
      %31 = vector.load %arg7[%c0_17, %c0_18] : memref<8x128xf32, #tpu.memory_space<vmem>>, vector<8x128xf32>
      tpu.vector_store %arg7[%c0_17, %c0_18], %30 {strides = array<i32>} : memref<8x128xf32, #tpu.memory_space<vmem>>, vector<8x128xf32>,
    } else {
    }
    return
  }
  func.func @transform_0(%arg0: i32, %arg1: i32) -> (i32, i32) {
    %c0_i32 = arith.constant 0 : i32
    %c0_i32_0 = arith.constant 0 : i32
    return %arg0, %c0_i32 : i32, i32
  }
  func.func @transform_1(%arg0: i32, %arg1: i32) -> (i32, i32) {
    %c0_i32 = arith.constant 0 : i32
    %c0_i32_0 = arith.constant 0 : i32
    %c0_i32_1 = arith.constant 0 : i32
    return %c0_i32, %c0_i32_0 : i32, i32
  }
  func.func @transform_2(%arg0: i32, %arg1: i32) -> (i32, i32) {
    %c0_i32 = arith.constant 0 : i32
    %c0_i32_0 = arith.constant 0 : i32
    %c0_i32_1 = arith.constant 0 : i32
    return %c0_i32, %c0_i32_0 : i32, i32
  }
  func.func @transform_3(%arg0: i32, %arg1: i32) -> (i32, i32) {
    %c0_i32 = arith.constant 0 : i32
    %c0_i32_0 = arith.constant 0 : i32
    %c0_i32_1 = arith.constant 0 : i32
    return %c0_i32, %c0_i32_0 : i32, i32
  }
  func.func @transform_4(%arg0: i32, %arg1: i32) -> (i32, i32) {
    %c0_i32 = arith.constant 0 : i32
    %c0_i32_0 = arith.constant 0 : i32
    %c0_i32_1 = arith.constant 0 : i32
    return %c0_i32, %c0_i32_0 : i32, i32
  }
  func.func @transform_5(%arg0: i32, %arg1: i32) -> (i32, i32) {
    %c0_i32 = arith.constant 0 : i32
    %c0_i32_0 = arith.constant 0 : i32
    return %arg0, %c0_i32 : i32, i32
  }
}

</mosaic_0001>

<bundles_post_ra>
// kernel: tpu_custom_call.1
= control target key start
LH: loop header
LB: loop body
LE: loop exit
PB: predicated region body
PF: predicated region fallthrough
CT: control target
= control target key end

     0   :  { %10 = vsyncpa [#allocation3], 0  ;;  %s1319_s0 = inlined_call_operand.hbm [shape: f32[16,128], index: 0, kind: input, shape index: {}]   ;;  %s1320_s1 = inlined_call_operand.hbm [shape: bf16[128,128], index: 1, kind: input, shape index: {}]   ;;  %s1321_s2 = inlined_call_operand.vmem [shape: f32[1,128], index: 2, kind: input, shape index: {}]   ;;  %s1322_s3 = inlined_call_operand.hbm [shape: bf16[128,128], index: 3, kind: input, shape index: {}]   ;;  %s1323_s4 = inlined_call_operand.vmem [shape: f32[1,128], index: 4, kind: input, shape index: {}]   ;;  %s1324_s5 = inlined_call_operand.hbm [shape: f32[16,128], index: 5, kind: output, shape index: {}]  }
   0x1   :  { %12 = vsyncpa [#allocation3 + $0x1], 0 }
   0x2   :  { %13 = vsyncpa [#allocation6], 0 }
   0x3   :  { %14 = vsyncpa [#allocation4], 0 }
   0x4   :  { %16 = vsyncpa [#allocation4 + $0x1], 0  ;;  %s1056_s18 = smov 0   ;;  %s1058_s19 = smov 0  }
   0x5   :  { %s1060_s20 = smov 0   ;;  %s1062_s21 = smov 0  }
   0x6   :  { %s1064_s22 = smov 0   ;;  %s1066_s23 = smov 0  }
   0x7 LB: > { %s646_s24 = sadd.s32 4294967295, %s1016_s23   ;;  %s647_s25 = sadd.s32 4294967294, %s1016_s23   ;;  %s1016_s23 = sphi %s1066_s23, %s22_s23   ;;  %s1012_s22 = sphi %s1064_s22, %s1346_s22   ;;  %s1008_s21 = sphi %s1062_s21, %s1345_s21   ;;  %s1004_s20 = sphi %s1060_s20, %s1344_s20   ;;  %s1000_s19 = sphi %s1058_s19, %s1343_s19   ;;  %s996_s18 = sphi %s1056_s18, %s1342_s18  }
   0x8   : > { %p54_p0 = scmp.ne.s32.totalorder %s1000_s19, %s996_s18  ;;  %p1090_p1 = scmp.eq.s32.totalorder %s646_s24, 0 }
   0x9   : > { %p1094_p2 = scmp.eq.s32.totalorder %s646_s24, 1  ;;  %p168_p3 = scmp.eq.s32.totalorder %s647_s25, 1 }
   0xa   : > { %s1329_s26 = scalar_select %p1090_p1, 1, 0 }
   0xb   : > { %p1100_p4 = por %p1090_p1, %p54_p0  ;;  %p648_p5 = scmp.ge.s32.totalorder %s1016_s23, 1 }
   0xc   : > { %p1105_p6 = por %p168_p3, %p54_p0  ;;  %p175_p7 = scmp.lt.s32.totalorder %s1016_s23, 3 }
   0xd   : > { %s1331_s28 = scalar_select %p1100_p4, 1, 0 }
   0xe   : > { %s1332_s29 = scalar_select %p1105_p6, 1, 0 }
   0xf   : > { %p1110_p8 = pnand %p648_p5, %p175_p7  ;;  %s1018_s6 = smov [#allocation5]  }
  0x10   : > { %s187_s7 = sshll.u32 %s1018_s6, 4  ;;  %s1019_s9 = smov [#allocation7]   ;;  %s1114_s7 = int_to_ptr.vmem [resolvable:$true] %s187_s7 }
  0x11   : > { %p751_p9 = pneg %p1110_p8  ;;  %s203_s10 = sshll.u32 %s1019_s9, 4  ;;  %s1125_s10 = int_to_ptr.vmem [resolvable:$true] %s203_s10 }
  0x12   : > { %s844_s13 = scalar_lea.hbm %s1320_s1, 1024 }
  0x13   : > { %p1121_p11 = pnand %p751_p9, %p1090_p1  ;;  %p845_p12 = scmp.ne.s32.totalorder %s1320_s1, %s844_s13 }
  0x14   : > { %p851_p5 = scmp.lt.u32.totalorder %s844_s13, %s1320_s1 }
  0x15   : > { %p846_p13 = pneg %p1121_p11 }
  0x17   : > { %p847_p0 = pnand %p846_p13, %p845_p12 }
  0x19   : > { %p848_p3 = pneg %p847_p0 }
  0x1b   : > { %p853_p7 = pnand %p851_p5, %p848_p3 }
  0x1d   : > { %856 = shalt.err (!%p853_p7)
}
  0x1e   : > { %s857_s24 = scalar_lea.vmem %s1114_s7, 1024  ;;  %p865_p1 = scmp.lt.s32.totalorder %s1114_s7, %s1114_s7 }
  0x1f   : > { %p858_p9 = scmp.ne.s32.totalorder %s1114_s7, %s857_s24  ;;  %p866_p12 = scmp.lt.s32.totalorder %s857_s24, %s857_s24 }
  0x21   : > { %p860_p10 = pnand %p858_p9, %p846_p13  ;;  %p867_p0 = por %p866_p12, %p865_p1 }
  0x23   : > { %p861_p6 = pneg %p860_p10 }
  0x25   : > { %p868_p4 = pnand %p867_p0, %p861_p6 }
  0x27   : > { %871 = shalt.err (!%p868_p4)
}
  0x28   : > { %s1020_s25 = smov 64   ;;  %s1021_s6 = smov 4  }
  0x29   : > { %754 = dma.hbm_to_vmem [thread:$0]  (!%p1121_p11), %s1320_s1, 1024, %s1114_s7, [#allocation6], %s1020_s25, %s1020_s25, %s1021_s6  }
  0x2a   : > { %s872_s14 = scalar_lea.hbm %s1322_s3, 1024 }
  0x2b   : > { %p873_p1 = scmp.ne.s32.totalorder %s1322_s3, %s872_s14  ;;  %p879_p10 = scmp.lt.u32.totalorder %s872_s14, %s1322_s3 }
  0x2d   : > { %p875_p4 = pnand %p873_p1, %p846_p13 }
  0x2f   : > { %p876_p6 = pneg %p875_p4 }
  0x31   : > { %p881_p3 = pnand %p879_p10, %p876_p6 }
  0x33   : > { %884 = shalt.err (!%p881_p3)
}
  0x34   : > { %s885_s7 = scalar_lea.vmem %s1125_s10, 1024  ;;  %p893_p12 = scmp.lt.s32.totalorder %s1125_s10, %s1125_s10 }
  0x35   : > { %p886_p5 = scmp.ne.s32.totalorder %s1125_s10, %s885_s7  ;;  %p894_p0 = scmp.lt.s32.totalorder %s885_s7, %s885_s7 }
  0x37   : > { %p888_p7 = pnand %p886_p5, %p846_p13  ;;  %p895_p1 = por %p894_p0, %p893_p12 }
  0x39   : > { %p889_p9 = pneg %p888_p7 }
  0x3b   : > { %p896_p4 = pnand %p895_p1, %p889_p9 }
  0x3d   : > { %899 = shalt.err (!%p896_p4)
}
  0x3e   : > { %757 = dma.hbm_to_vmem [thread:$0]  (!%p1121_p11), %s1322_s3, 1024, %s1125_s10, [#allocation6], %s1020_s25, %s1020_s25, %s1021_s6  }
  0x3f   : > { %s34_s12 = sadd.s32 1, %s1012_s22  ;;  %s41_s13 = sadd.s32 1, %s1004_s20 }
  0x40   : > { %p36_p13 = scmp.ge.s32.totalorder %s34_s12, 2  ;;  %p48_p6 = scmp.ne.s32.totalorder %s1004_s20, %s1000_s19 }
  0x41   : > { %p49_p10 = scmp.eq.s32.totalorder %s1016_s23, 0  ;;  %p768_p3 = scmp.lt.s32.totalorder %s1016_s23, 2 }
  0x42   : > { %s1348_s12 = smov (%p36_p13, %s34_s12), 0  ;;  %p1189_p7 = por %p1094_p2, %p48_p6 }
  0x43   : > { %p50_p5 = por %p49_p10, %p48_p6  ;;  %s38_s14 = ssub.s32 %s1012_s22, %s1348_s12 }
  0x44   : > { %s1335_s8 = scalar_select %p1189_p7, 1, 0 }
  0x45   : > { %s220_s15 = sand.u32 1, %s1004_s20   ;;  %p39_p9 = scmp.eq.s32.totalorder %s38_s14, 0 }
  0x46   : > { %s652_s10 = sshll.u32 %s220_s15, 3  ;;  %s653_s25 = sshll.u32 %s1012_s22, 7 }
  0x47   : > { %s1198_s6 = scalar_select %p39_p9, %s1004_s20, %s41_s13  }
  0x48   : > { %s1203_s24 = scalar_lea.hbm %s1319_s0, %s653_s25  ;;  %s224_s27 = scalar_lea.vmem [#allocation2], %s652_s10 }
  0x49   : > { %s231_s7 = sshll.u32 %s224_s27, 4  ;;  %p1207_p2 = pnand %p768_p3, %p50_p5  ;;  %s1211_s7 = int_to_ptr.vmem [resolvable:$true] %s231_s7 }
  0x4a   : > { %s221_s11 = scalar_lea.sflag [#allocation3], %s220_s15  ;;  %s900_s13 = scalar_lea.hbm %s1203_s24, 128 }
  0x4b   : > { %p901_p11 = scmp.ne.s32.totalorder %s1203_s24, %s900_s13  ;;  %p902_p12 = pneg %p1207_p2 }
  0x4c   : > { %s905_s25 = scalar_lea.hbm %s1319_s0, 256  ;;  %p906_p4 = scmp.lt.u32.totalorder %s1203_s24, %s1319_s0 }
  0x4d   : > { %p903_p0 = pnand %p902_p12, %p901_p11  ;;  %p907_p13 = scmp.lt.u32.totalorder %s905_s25, %s900_s13 }
  0x4e   : > { %p909_p10 = scmp.lt.u32.totalorder %s900_s13, %s1203_s24 }
  0x4f   : > { %p904_p1 = pneg %p903_p0  ;;  %p908_p6 = por %p907_p13, %p906_p4 }
  0x51   : > { %p910_p3 = por %p909_p10, %p908_p6 }
  0x53   : > { %p911_p5 = pnand %p910_p3, %p904_p1 }
  0x55   : > { %914 = shalt.err (!%p911_p5)
}
  0x56   : > { %s915_s15 = scalar_lea.vmem %s1211_s7, 128  ;;  %s1022_s27 = smov [#allocation2]  }
  0x57   : > { %p916_p9 = scmp.ne.s32.totalorder %s1211_s7, %s915_s15  ;;  %s920_s14 = sshll.u32 %s1022_s27, 4  ;;  %s921_s14 = int_to_ptr.vmem [resolvable:$false] %s920_s14 }
  0x58   : > { %s922_s10 = scalar_lea.vmem %s921_s14, 256  ;;  %p923_p7 = scmp.lt.s32.totalorder %s1211_s7, %s921_s14 }
  0x59   : > { %p918_p11 = pnand %p916_p9, %p902_p12  ;;  %p924_p4 = scmp.lt.s32.totalorder %s922_s10, %s915_s15 }
  0x5b   : > { %p919_p0 = pneg %p918_p11  ;;  %p925_p13 = por %p924_p4, %p923_p7 }
  0x5d   : > { %p926_p6 = pnand %p925_p13, %p919_p0 }
  0x5f   : > { %929 = shalt.err (!%p926_p6)
}
  0x60   : > { %761 = dma.hbm_to_vmem [thread:$0]  (!%p1207_p2), %s1203_s24, 128, %s1211_s7, %s221_s11  }
  0x61   : > { %240 = sbr.rel (%p1110_p8) target bundleno = 616 (0x268), region = 40  ;;  %s1241_s13 = sand.u32 (!%p1110_p8), 1, %s1000_s19  }
  0x62   : > { %s655_s25 = sshll.u32 (!%p1110_p8), %s1241_s13, 3  ;;  %s243_s16 = scalar_lea.sflag (!%p1110_p8), [#allocation3], %s1241_s13 }
  0x63   : > { %s1247_s17 = scalar_lea.vmem (!%p1110_p8), [#allocation2], %s655_s25  ;;  %p1337_p7 = scmp.ne.s32.totalorder (!%p1110_p8), %s1331_s28, 0 }
  0x68   : > { %983 = dma.done.wait (%p1337_p7), %s243_s16, 128  }
  0x69   : > { %985 = vsyncadd (%p1337_p7), %s243_s16, 4294967168  ;;  %p1338_p2 = scmp.ne.s32.totalorder %s1329_s26, 0 }
  0x6b   : > { %987 = dma.done.wait (%p1338_p2), [#allocation6], 2048  }
  0x6c   : > { %989 = vsyncadd (%p1338_p2), [#allocation6], 4294965248  ;;  %v1023_v0 = vmov 0.0   ;;  %vm1024_vm0 = vmmov 0   ;;  %v826_v1 = vld [vmem:[#allocation5] sm:$0xff]   ;;  %v827_v2 = vld [vmem:[#allocation5 + $0x8] sm:$0xff]  }
  0x6d   : > { %699 = vmatprep.subr.bf16.mxu0 %v1023_v0  ;;  %715 = vmatprep.mubr.msk.bf16.mxu0 %vm1024_vm0, %v1023_v0  ;;  %v828_v3 = vld [vmem:[#allocation5 + $0x10] sm:$0xff]   ;;  %v829_v4 = vld [vmem:[#allocation5 + $0x18] sm:$0xff]   ;;  %v830_v5 = vld [vmem:[#allocation5 + $0x20] sm:$0xff]   ;;  %s678_s7 = sshll.u32 %s1008_s21, 7  ;;  %s280_s9 = scalar_lea.vmem [#allocation8], %s655_s25 }
  0x6e   : > { %719 = vmatprep.subr.bf16.mxu1 %v1023_v0  ;;  %735 = vmatprep.mubr.msk.bf16.mxu1 %vm1024_vm0, %v1023_v0  ;;  %v831_v6 = vld [vmem:[#allocation5 + $0x28] sm:$0xff]   ;;  %v832_v7 = vld [vmem:[#allocation5 + $0x30] sm:$0xff]   ;;  %v833_v8 = vld [vmem:[#allocation5 + $0x38] sm:$0xff]   ;;  %s549_s11 = sshll.u32 %s280_s9, 4  ;;  %s1270_s14 = scalar_lea.hbm %s1324_s5, %s678_s7  ;;  %s1272_s11 = int_to_ptr.vmem [resolvable:$true] %s549_s11 }
  0x6f   : > { %700 = vmatpush3.bf16.msra.mxu0 %v826_v1  ;;  %v286_v9 = vld [vmem:[%s1247_s17] sm:$0xff]  ;;  %v834_v11 = vld [vmem:[#allocation7] sm:$0xff]   ;;  %v835_v12 = vld [vmem:[#allocation7 + $0x8] sm:$0xff]   ;;  %s536_s21 = scalar_lea.sflag [#allocation4], %s1241_s13  ;;  %s930_s10 = scalar_lea.vmem %s1272_s11, 128 }
  0x70   : > { %701 = vmatprep.subr.bf16.mxu0 %v1023_v0  ;;  %v287_v10 = vpack.c.bf16 %v286_v9, %v286_v9  ;;  %720 = vmatpush3.bf16.msra.mxu1 %v834_v11  ;;  %v836_v13 = vld [vmem:[#allocation7 + $0x10] sm:$0xff]   ;;  %v837_v14 = vld [vmem:[#allocation7 + $0x18] sm:$0xff]   ;;  %v838_v15 = vld [vmem:[#allocation7 + $0x20] sm:$0xff]   ;;  %p931_p8 = scmp.ne.s32.totalorder %s1272_s11, %s930_s10  ;;  %p1339_p12 = scmp.ne.s32.totalorder %s1335_s8, 0 }
  0x71   : > { %721 = vmatprep.subr.bf16.mxu1 %v1023_v0  ;;  %v839_v16 = vld [vmem:[#allocation7 + $0x28] sm:$0xff]   ;;  %v840_v17 = vld [vmem:[#allocation7 + $0x30] sm:$0xff]   ;;  %v841_v18 = vld [vmem:[#allocation7 + $0x38] sm:$0xff]   ;;  %s1025_s25 = smov [#allocation8]  }
  0x72   : > { %v659_v19 = vld [vmem:[%s1321_s2] ss:$0 sm:$0xff]  ;;  %p932_p1 = pnand %p931_p8, %p1339_p12  ;;  %s934_s16 = sshll.u32 %s1025_s25, 4  ;;  %s935_s16 = int_to_ptr.vmem [resolvable:$false] %s934_s16 }
  0x73   : > { %702 = vmatpush3.bf16.msra.mxu0 %v827_v2  ;;  %v676_v35 = vld [vmem:[%s1323_s4] ss:$0 sm:$0xff]  ;;  %s936_s17 = scalar_lea.vmem %s935_s16, 256  ;;  %p937_p3 = scmp.lt.s32.totalorder %s1272_s11, %s935_s16 }
  0x74   : > { %703 = vmatprep.subr.bf16.mxu0 %v1023_v0  ;;  %722 = vmatpush3.bf16.msra.mxu1 %v835_v12  ;;  %p933_p10 = pneg %p932_p1  ;;  %p938_p5 = scmp.lt.s32.totalorder %s936_s17, %s930_s10 }
  0x75   : > { %723 = vmatprep.subr.bf16.mxu1 %v1023_v0 }
  0x76   : > { %p939_p9 = por %p938_p5, %p937_p3 }
  0x77   : > { %704 = vmatpush3.bf16.msra.mxu0 %v828_v3 }
  0x78   : > { %705 = vmatprep.subr.bf16.mxu0 %v1023_v0  ;;  %724 = vmatpush3.bf16.msra.mxu1 %v836_v13  ;;  %p940_p11 = pnand %p939_p9, %p933_p10 }
  0x79   : > { %725 = vmatprep.subr.bf16.mxu1 %v1023_v0 }
  0x7b   : > { %706 = vmatpush3.bf16.msra.mxu0 %v829_v4 }
  0x7c   : > { %707 = vmatprep.subr.bf16.mxu0 %v1023_v0  ;;  %726 = vmatpush3.bf16.msra.mxu1 %v837_v14 }
  0x7d   : > { %727 = vmatprep.subr.bf16.mxu1 %v1023_v0 }
  0x7f   : > { %708 = vmatpush3.bf16.msra.mxu0 %v830_v5 }
  0x80   : > { %709 = vmatprep.subr.bf16.mxu0 %v1023_v0  ;;  %728 = vmatpush3.bf16.msra.mxu1 %v838_v15 }
  0x81   : > { %729 = vmatprep.subr.bf16.mxu1 %v1023_v0 }
  0x83   : > { %710 = vmatpush3.bf16.msra.mxu0 %v831_v6 }
  0x84   : > { %711 = vmatprep.subr.bf16.mxu0 %v1023_v0  ;;  %730 = vmatpush3.bf16.msra.mxu1 %v839_v16 }
  0x85   : > { %731 = vmatprep.subr.bf16.mxu1 %v1023_v0 }
  0x87   : > { %712 = vmatpush3.bf16.msra.mxu0 %v832_v7 }
  0x88   : > { %713 = vmatprep.subr.bf16.mxu0 %v1023_v0  ;;  %732 = vmatpush3.bf16.msra.mxu1 %v840_v17 }
  0x89   : > { %733 = vmatprep.subr.bf16.mxu1 %v1023_v0 }
  0x8b   : > { %714 = vmatpush3.bf16.msra.mxu0 %v833_v8 }
  0x8c   : > { %734 = vmatpush3.bf16.msra.mxu1 %v841_v18 }
  0x8e   : > { %716 = vmatmul.mubr.bf16.vlgmr.msra.gmra.mrb[0].mxu0 %v287_v10 }
 0x161   : > { %v393_v20 = vpop.f32.mrb[0].mxu0 }
 0x162   : > { %v394_v21 = vadd.f32 %v659_v19, %v393_v20  ;;  %v717_v22 = vpop.f32.mrb[1].mxu0 }
 0x163   : > { %v396_v23 = vpop.f32.mrb[2].mxu0 }
 0x164   : > { %v399_v24 = vpack.c.bf16 %v394_v21, %v394_v21  ;;  %v718_v25 = vpop.f32.mrb[3].mxu0 }
 0x166   : > { %v400_v26 = vmul.bf16 %v399_v24, %v399_v24 }
 0x168   : > { %v401_v27 = vmul.bf16 %v400_v26, %v399_v24 }
 0x16a   : > { %v402_v28 = vmul.bf16 1027030327, %v401_v27 }
 0x16c   : > { %v403_v29 = vadd.bf16 %v402_v28, %v399_v24 }
 0x16e   : > { %v404_v30 = vmul.bf16 1061961548, %v403_v29 }
 0x170   : > { %842 = vtanh.bf16 %v404_v30 }
 0x17b   : > { %v843_v31 = vpop.eup %842 }
 0x17c   : > { %v406_v32 = vadd.bf16 1065369472, %v843_v31 }
 0x17e   : > { %v407_v33 = vmul.bf16 1056980736, %v406_v32 }
 0x180   : > { %v408_v34 = vmul.bf16 %v407_v33, %v399_v24 }
 0x182   : > { %736 = vmatmul.mubr.bf16.vlgmr.msra.gmra.mrb[0].mxu1 %v408_v34 }
 0x255   : > { %v507_v36 = vpop.f32.mrb[0].mxu1 }
 0x256   : > { %v524_v37 = vadd.f32 %v676_v35, %v507_v36  ;;  %v737_v38 = vpop.f32.mrb[1].mxu1 }
 0x257   : > { %v510_v39 = vpop.f32.mrb[2].mxu1 }
 0x258   : > { %v526_v40 = vadd.f32 %v524_v37, %v286_v9  ;;  %v738_v41 = vpop.f32.mrb[3].mxu1 }
 0x25a   : > { %527 = vst [vmem:[%s280_s9] sm:$0xff] %v526_v40 }
 0x25b   : > { %943 = shalt.err (!%p940_p11)
}
 0x25c   : > { %s944_s13 = scalar_lea.hbm %s1270_s14, 128  ;;  %s948_s30 = scalar_lea.hbm %s1324_s5, 256 }
 0x25d   : > { %p945_p0 = scmp.ne.s32.totalorder %s1270_s14, %s944_s13  ;;  %p949_p6 = scmp.lt.u32.totalorder %s1270_s14, %s1324_s5 }
 0x25e   : > { %p950_p7 = scmp.lt.u32.totalorder %s948_s30, %s944_s13  ;;  %p952_p8 = scmp.lt.u32.totalorder %s944_s13, %s1270_s14 }
 0x25f   : > { %p946_p4 = pnand %p945_p0, %p1339_p12 }
 0x260   : > { %p951_p2 = por %p950_p7, %p949_p6 }
 0x261   : > { %p947_p13 = pneg %p946_p4 }
 0x262   : > { %p953_p1 = por %p952_p8, %p951_p2 }
 0x264   : > { %p954_p10 = pnand %p953_p1, %p947_p13 }
 0x266   : > { %957 = shalt.err (!%p954_p10)
}
 0x267   : > { %749 = dma.vmem_to_hbm [thread:$0]  (%p1339_p12), %s1272_s11, 128, %s1270_s14, %s536_s21  }
 0x268 PF: > { %s561_s9 = sand.u32 1, %s996_s18   ;;  %p1340_p3 = scmp.ne.s32.totalorder %s1332_s29, 0 }
 0x269   : > { %p1341_p5 = scmp.ge.s32.totalorder %s1016_s23, 2  ;;  %s562_s15 = scalar_lea.sflag [#allocation4], %s561_s9 }
 0x26b   : > { %p763_p9 = pnand %p1341_p5, %p1340_p3 }
 0x26d   : > { %991 = dma.done.wait (!%p763_p9), %s562_s15, 128  }
 0x26e   : > { %993 = vsyncadd (!%p763_p9), %s562_s15, 4294967168  ;;  %s22_s23 = sadd.s32 1, %s1016_s23   ;;  %s1342_s18 = smov %s1000_s19 }
 0x26f   : > { %p19_p11 = scmp.ge.s32.totalorder %s22_s23, 4   ;;  %s1343_s19 = smov %s1004_s20 }
 0x270   : > { %s1344_s20 = smov %s1198_s6  ;;  %s1345_s21 = smov %s1012_s22 }
 0x271   : > { %s1346_s22 = smov %s1348_s12  ;;  %21 = sbr.rel (!%p19_p11) target bundleno = 7 (0x7), region = 101 }
 0x278   :  { %567 = vsyncpa [#allocation3], 1 }
 0x279   :  { %569 = vsyncpa [#allocation3 + $0x1], 1 }
 0x27a   :  { %570 = vsyncpa [#allocation6], 1 }
 0x27b   :  { %571 = vsyncpa [#allocation4], 1 }
 0x27c   :  { %573 = vsyncpa [#allocation4 + $0x1], 1 }

</bundles_post_ra>
